<compile_context>
chip_gen: v6e
topology: v6e:2x2x1
jax: 0.10.0
libtpu: 0.0.40
codegen_flags: <defaults>
</compile_context>

<pallas_src>
from functools import partial

import jax
import jax.numpy as jnp
from jax.experimental import pallas as pl
from jax.experimental.pallas import tpu as pltpu

LANE = 128  # TPU lane tile


def _round_up(n, m):
    return (n + m - 1) // m * m


# ----------------------------- Pallas kernel ------------------------------- #
def _upsample_conv_kernel(H, Wp, Ws, Ci, Co,
                          xp_ref, wf_ref, b_ref, out_ref, patch_ref):
    """One batch element.

    xp_ref   : (Ci, 2*LANE + (H+2)*Wp) bf16  column-upsampled activation, flat:
               [LANE zeros | row -1 zeros | rows 0..H-1 | row H zeros | LANE zeros],
               each row Wp wide (columns >= Ws are zero pad).
    wf_ref   : (2*Co, 9*Ci) bf16  fused even/odd-parity effective 2x3 weights
               ((dr,dx)-major, channel-minor K layout; unused taps zeroed).
    b_ref    : (2*Co, 1)    f32   conv bias, repeated per parity.
    out_ref  : (Co, 2*H*Wp) bf16  flattened NCHW output (rows interleaved).
    patch_ref: (9*Ci, H*Wp) bf16  im2col scratch.
    """
    L = H * Wp
    need_col_mask = (Wp == Ws)   # no spare zero pad column -> mask dx = +-1 edges

    if need_col_mask:
        col = jax.lax.broadcasted_iota(jnp.int32, (1, L), 1) % Wp
        not_left = col > 0
        not_right = col < Ws - 1

    # im2col: 9 taps, (dr, dx)-major, channel-minor.  Every tap is a static
    # contiguous slice of the flat padded activation (no rolls, no masks in the
    # padded-width path, no extra activation copy).
    t = 0
    for dr in (-1, 0, 1):
        for dx in (-1, 0, 1):
            lo = LANE + (1 + dr) * Wp + dx
            tap = xp_ref[:, lo:lo + L]                       # (Ci, L)
            if need_col_mask:
                if dx == -1:
                    tap = jnp.where(not_left, tap, jnp.zeros_like(tap))
                elif dx == 1:
                    tap = jnp.where(not_right, tap, jnp.zeros_like(tap))
            patch_ref[t * Ci:(t + 1) * Ci, :] = tap
            t += 1

    # Single fused MXU dot (f32 accumulation): rows 0..Co-1 = even output rows,
    # rows Co..2Co-1 = odd output rows.
    y = jnp.dot(wf_ref[...], patch_ref[...],
                preferred_element_type=jnp.float32) + b_ref[...]    # (2Co, L)
    y = y.astype(out_ref.dtype)

    # In-register row interleave at lane-tile granularity (Wp % 128 == 0 in the
    # padded path), then ONE lane-dense full-block store.
    y_even = y[0:Co, :]
    y_odd = y[Co:2 * Co, :]
    parts = []
    for u in range(H):
        parts.append(y_even[:, u * Wp:(u + 1) * Wp])
        parts.append(y_odd[:, u * Wp:(u + 1) * Wp])
    out_ref[...] = jnp.concatenate(parts, axis=1)


# ------------------------------ JAX wrapper -------------------------------- #
def upsample_forward(x, weight, bias):
    """x: (B, C, H, W) f32; weight: (C, C, 3, 3) f32 (eq-lr scale baked in); bias: (C,)."""
    B, Ci, H, W = x.shape
    Co = weight.shape[0]
    Ws = 2 * W                       # upsampled width (columns materialized here)
    Wp = _round_up(Ws, LANE)         # lane-tile padded width (cropped after the call)
    Hs = 2 * H
    L = H * Wp
    pad_len = 2 * LANE + (H + 2) * Wp

    # Column-wise nearest upsample + all zero padding, once, in the wrapper.
    xc = jnp.repeat(x.astype(jnp.bfloat16), 2, axis=3)             # (B,Ci,H,Ws)
    xp = jnp.pad(xc, ((0, 0), (0, 0), (1, 1), (0, Wp - Ws)))       # (B,Ci,H+2,Wp)
    xp = jnp.pad(xp.reshape(B, Ci, (H + 2) * Wp),
                 ((0, 0), (0, 0), (LANE, LANE)))                   # (B,Ci,pad_len)

    # Fused even/odd-parity effective 2(row)x3(col) weights in one matrix:
    #   even rows: dr=-1 -> w[ky=0]       ; dr=0 -> w[ky=1]+w[ky=2] ; dr=+1 -> 0
    #   odd  rows: dr=-1 -> 0             ; dr=0 -> w[ky=0]+w[ky=1] ; dr=+1 -> w[ky=2]
    w = weight.astype(jnp.float32)
    zer = jnp.zeros_like(w[:, :, 0, :])
    w_even = jnp.stack([w[:, :, 0, :], w[:, :, 1, :] + w[:, :, 2, :], zer], axis=2)
    w_odd = jnp.stack([zer, w[:, :, 0, :] + w[:, :, 1, :], w[:, :, 2, :]], axis=2)
    wf = jnp.concatenate([w_even, w_odd], axis=0)                  # (2Co,Ci,3dr,3kx)
    # (2Co, Ci, dr, kx) -> (2Co, dr, kx, Ci) -> (2Co, 9Ci): column = tap*Ci + i,
    # matching the (dr, dx)-major / channel-minor im2col layout in the kernel.
    wf = jnp.transpose(wf, (0, 2, 3, 1)).reshape(2 * Co, 9 * Ci).astype(jnp.bfloat16)
    bvec = jnp.concatenate([bias, bias]).reshape(2 * Co, 1).astype(jnp.float32)

    kernel = partial(_upsample_conv_kernel, H, Wp, Ws, Ci, Co)

    # Exact double-buffered VMEM bytes (+2x headroom), capped for v7x (64 MiB).
    bytes_blocks = (2 * (Ci * pad_len * 2)            # activation block, bf16
                    + 2 * (Co * Hs * Wp * 2)          # output block, bf16
                    + 2 * (2 * Co * 9 * Ci * 2)       # fused weights, bf16
                    + 2 * (2 * Co * 4))               # bias, f32
    bytes_scratch = 9 * Ci * L * 2                    # im2col scratch, bf16
    vmem_limit = int(min(40 * 1024 * 1024,
                         max(16 * 1024 * 1024, 2 * (bytes_blocks + bytes_scratch))))

    out = pl.pallas_call(
        kernel,
        out_shape=jax.ShapeDtypeStruct((B, Co, Hs * Wp), jnp.bfloat16),
        grid=(B,),
        in_specs=[
            pl.BlockSpec((None, Ci, pad_len), lambda b: (b, 0, 0)),   # activation
            pl.BlockSpec((2 * Co, 9 * Ci), lambda b: (0, 0)),         # fused weights
            pl.BlockSpec((2 * Co, 1), lambda b: (0, 0)),              # bias
        ],
        out_specs=pl.BlockSpec((None, Co, Hs * Wp), lambda b: (b, 0, 0)),
        scratch_shapes=[
            pltpu.VMEM((9 * Ci, L), jnp.bfloat16),                    # im2col taps
        ],
        compiler_params=pltpu.CompilerParams(
            dimension_semantics=("parallel",),
            vmem_limit_bytes=vmem_limit,
        ),
    )(xp, wf, bvec)

    # Free reshape (memory order already (b, o, r, c)); crop pad columns and
    # restore the module's f32 output dtype in one fused XLA pass.
    return out.reshape(B, Co, Hs, Wp)[:, :, :, :Ws].astype(jnp.float32)


# --------------------------- pure-JAX reference ----------------------------- #
def ref_upsample(x, weight, bias):
    xu = jnp.repeat(jnp.repeat(x, 2, axis=2), 2, axis=3)
    y = jax.lax.conv_general_dilated(
        xu, weight, window_strides=(1, 1), padding=((1, 1), (1, 1)),
        dimension_numbers=("NCHW", "OIHW", "NCHW"))
    return y + bias.reshape(1, -1, 1, 1)


if __name__ == "__main__":
    B, C, H, W = 2, 4, 16, 16

    key = jax.random.PRNGKey(0)
    kx, kw, kb = jax.random.split(key, 3)
    x = jax.random.normal(kx, (B, C, H, W), jnp.float32)
    w_raw = jax.random.normal(kw, (C, C, 3, 3), jnp.float32)
    weight = w_raw * (2.0 / (C * 9)) ** 0.5        # ScaledConv2d equalized-lr scale
    bias = 0.1 * jax.random.normal(kb, (C,), jnp.float32)

    out = jax.jit(upsample_forward)(x, weight, bias)
    out = jax.block_until_ready(out)

    expected = ref_upsample(x, weight, bias)
    assert out.shape == (B, C, 2 * H, 2 * W)
    max_err = float(jnp.max(jnp.abs(out - expected)))
    # bf16 MXU operands + bf16 output with f32 accumulation -> small quant error.
    assert jnp.allclose(out, expected, rtol=7e-2, atol=7e-2), max_err
    print("KERNEL_OK")
</pallas_src>

<mosaic_0001>
module attributes {stable_mosaic.version = 11 : i64} {
  func.func @_upsample_conv_kernel(%arg0: i32, %arg1: memref<1x4x2560xbf16, #tpu.memory_space<vmem>>, %arg2: memref<8x36xbf16, #tpu.memory_space<vmem>>, %arg3: memref<8x1xf32, #tpu.memory_space<vmem>>, %arg4: memref<1x4x4096xbf16, #tpu.memory_space<vmem>>, %arg5: memref<36x2048xbf16, #tpu.memory_space<vmem>>) attributes {dimension_semantics = [#tpu.dimension_semantics<parallel>], iteration_bounds = array<i64: 2>, scalar_prefetch = 0 : i64, scratch_operands = 1 : i64, tpu.core_type = #tpu.core_type<tc>, window_params = [{transform_indices = @transform_0, window_bounds = array<i64: 1, 4, 2560>}, {pipeline_mode = #tpu.pipeline_mode<synchronous>, transform_indices = @transform_1, window_bounds = array<i64: 8, 36>}, {pipeline_mode = #tpu.pipeline_mode<synchronous>, transform_indices = @transform_2, window_bounds = array<i64: 8, 1>}, {transform_indices = @transform_3, window_bounds = array<i64: 1, 4, 4096>}]} {
    %c0 = arith.constant 0 : index
    %c0_0 = arith.constant 0 : index
    %c127 = arith.constant 127 : index
    %0 = vector.load %arg1[%c0, %c0_0, %c127] : memref<1x4x2560xbf16, #tpu.memory_space<vmem>>, vector<1x4x2048xbf16>
    %1 = vector.shape_cast %0 : vector<1x4x2048xbf16> to vector<4x2048xbf16>
    %c0_1 = arith.constant 0 : index
    %c0_2 = arith.constant 0 : index
    %2 = vector.load %arg5[%c0_1, %c0_2] : memref<36x2048xbf16, #tpu.memory_space<vmem>>, vector<4x2048xbf16>
    tpu.vector_store %arg5[%c0_1, %c0_2], %1 {strides = array<i32>} : memref<36x2048xbf16, #tpu.memory_space<vmem>>, vector<4x2048xbf16>,
    %c0_3 = arith.constant 0 : index
    %c0_4 = arith.constant 0 : index
    %c128 = arith.constant 128 : index
    %3 = vector.load %arg1[%c0_3, %c0_4, %c128] : memref<1x4x2560xbf16, #tpu.memory_space<vmem>>, vector<1x4x2048xbf16>
    %4 = vector.shape_cast %3 : vector<1x4x2048xbf16> to vector<4x2048xbf16>
    %c4 = arith.constant 4 : index
    %c0_5 = arith.constant 0 : index
    %5 = vector.load %arg5[%c4, %c0_5] : memref<36x2048xbf16, #tpu.memory_space<vmem>>, vector<4x2048xbf16>
    tpu.vector_store %arg5[%c4, %c0_5], %4 {strides = array<i32>} : memref<36x2048xbf16, #tpu.memory_space<vmem>>, vector<4x2048xbf16>,
    %c0_6 = arith.constant 0 : index
    %c0_7 = arith.constant 0 : index
    %c129 = arith.constant 129 : index
    %6 = vector.load %arg1[%c0_6, %c0_7, %c129] : memref<1x4x2560xbf16, #tpu.memory_space<vmem>>, vector<1x4x2048xbf16>
    %7 = vector.shape_cast %6 : vector<1x4x2048xbf16> to vector<4x2048xbf16>
    %c8 = arith.constant 8 : index
    %c0_8 = arith.constant 0 : index
    %8 = vector.load %arg5[%c8, %c0_8] : memref<36x2048xbf16, #tpu.memory_space<vmem>>, vector<4x2048xbf16>
    tpu.vector_store %arg5[%c8, %c0_8], %7 {strides = array<i32>} : memref<36x2048xbf16, #tpu.memory_space<vmem>>, vector<4x2048xbf16>,
    %c0_9 = arith.constant 0 : index
    %c0_10 = arith.constant 0 : index
    %c255 = arith.constant 255 : index
    %9 = vector.load %arg1[%c0_9, %c0_10, %c255] : memref<1x4x2560xbf16, #tpu.memory_space<vmem>>, vector<1x4x2048xbf16>
    %10 = vector.shape_cast %9 : vector<1x4x2048xbf16> to vector<4x2048xbf16>
    %c12 = arith.constant 12 : index
    %c0_11 = arith.constant 0 : index
    %11 = vector.load %arg5[%c12, %c0_11] : memref<36x2048xbf16, #tpu.memory_space<vmem>>, vector<4x2048xbf16>
    tpu.vector_store %arg5[%c12, %c0_11], %10 {strides = array<i32>} : memref<36x2048xbf16, #tpu.memory_space<vmem>>, vector<4x2048xbf16>,
    %c0_12 = arith.constant 0 : index
    %c0_13 = arith.constant 0 : index
    %c256 = arith.constant 256 : index
    %12 = vector.load %arg1[%c0_12, %c0_13, %c256] : memref<1x4x2560xbf16, #tpu.memory_space<vmem>>, vector<1x4x2048xbf16>
    %13 = vector.shape_cast %12 : vector<1x4x2048xbf16> to vector<4x2048xbf16>
    %c16 = arith.constant 16 : index
    %c0_14 = arith.constant 0 : index
    %14 = vector.load %arg5[%c16, %c0_14] : memref<36x2048xbf16, #tpu.memory_space<vmem>>, vector<4x2048xbf16>
    tpu.vector_store %arg5[%c16, %c0_14], %13 {strides = array<i32>} : memref<36x2048xbf16, #tpu.memory_space<vmem>>, vector<4x2048xbf16>,
    %c0_15 = arith.constant 0 : index
    %c0_16 = arith.constant 0 : index
    %c257 = arith.constant 257 : index
    %15 = vector.load %arg1[%c0_15, %c0_16, %c257] : memref<1x4x2560xbf16, #tpu.memory_space<vmem>>, vector<1x4x2048xbf16>
    %16 = vector.shape_cast %15 : vector<1x4x2048xbf16> to vector<4x2048xbf16>
    %c20 = arith.constant 20 : index
    %c0_17 = arith.constant 0 : index
    %17 = vector.load %arg5[%c20, %c0_17] : memref<36x2048xbf16, #tpu.memory_space<vmem>>, vector<4x2048xbf16>
    tpu.vector_store %arg5[%c20, %c0_17], %16 {strides = array<i32>} : memref<36x2048xbf16, #tpu.memory_space<vmem>>, vector<4x2048xbf16>,
    %c0_18 = arith.constant 0 : index
    %c0_19 = arith.constant 0 : index
    %c383 = arith.constant 383 : index
    %18 = vector.load %arg1[%c0_18, %c0_19, %c383] : memref<1x4x2560xbf16, #tpu.memory_space<vmem>>, vector<1x4x2048xbf16>
    %19 = vector.shape_cast %18 : vector<1x4x2048xbf16> to vector<4x2048xbf16>
    %c24 = arith.constant 24 : index
    %c0_20 = arith.constant 0 : index
    %20 = vector.load %arg5[%c24, %c0_20] : memref<36x2048xbf16, #tpu.memory_space<vmem>>, vector<4x2048xbf16>
    tpu.vector_store %arg5[%c24, %c0_20], %19 {strides = array<i32>} : memref<36x2048xbf16, #tpu.memory_space<vmem>>, vector<4x2048xbf16>,
    %c0_21 = arith.constant 0 : index
    %c0_22 = arith.constant 0 : index
    %c384 = arith.constant 384 : index
    %21 = vector.load %arg1[%c0_21, %c0_22, %c384] : memref<1x4x2560xbf16, #tpu.memory_space<vmem>>, vector<1x4x2048xbf16>
    %22 = vector.shape_cast %21 : vector<1x4x2048xbf16> to vector<4x2048xbf16>
    %c28 = arith.constant 28 : index
    %c0_23 = arith.constant 0 : index
    %23 = vector.load %arg5[%c28, %c0_23] : memref<36x2048xbf16, #tpu.memory_space<vmem>>, vector<4x2048xbf16>
    tpu.vector_store %arg5[%c28, %c0_23], %22 {strides = array<i32>} : memref<36x2048xbf16, #tpu.memory_space<vmem>>, vector<4x2048xbf16>,
    %c0_24 = arith.constant 0 : index
    %c0_25 = arith.constant 0 : index
    %c385 = arith.constant 385 : index
    %24 = vector.load %arg1[%c0_24, %c0_25, %c385] : memref<1x4x2560xbf16, #tpu.memory_space<vmem>>, vector<1x4x2048xbf16>
    %25 = vector.shape_cast %24 : vector<1x4x2048xbf16> to vector<4x2048xbf16>
    %c32 = arith.constant 32 : index
    %c0_26 = arith.constant 0 : index
    %26 = vector.load %arg5[%c32, %c0_26] : memref<36x2048xbf16, #tpu.memory_space<vmem>>, vector<4x2048xbf16>
    tpu.vector_store %arg5[%c32, %c0_26], %25 {strides = array<i32>} : memref<36x2048xbf16, #tpu.memory_space<vmem>>, vector<4x2048xbf16>,
    %c0_27 = arith.constant 0 : index
    %c0_28 = arith.constant 0 : index
    %27 = vector.load %arg2[%c0_27, %c0_28] : memref<8x36xbf16, #tpu.memory_space<vmem>>, vector<8x36xbf16>
    %c0_29 = arith.constant 0 : index
    %c0_30 = arith.constant 0 : index
    %28 = vector.load %arg5[%c0_29, %c0_30] : memref<36x2048xbf16, #tpu.memory_space<vmem>>, vector<36x2048xbf16>
    %cst = arith.constant dense<0.000000e+00> : vector<8x2048xf32>
    %29 = tpu.matmul %27, %28, %cst {dimension_numbers = #tpu.dot_dimension_numbers<[1], [0], [0], [1], [0, 0, 1, 1], [], []>} : vector<8x36xbf16>, vector<36x2048xbf16>, vector<8x2048xf32> -> vector<8x2048xf32>
    %c0_31 = arith.constant 0 : index
    %c0_32 = arith.constant 0 : index
    %30 = vector.load %arg3[%c0_31, %c0_32] : memref<8x1xf32, #tpu.memory_space<vmem>>, vector<8x1xf32>
    %31 = vector.broadcast %30 : vector<8x1xf32> to vector<8x2048xf32>
    %32 = arith.addf %29, %31 : vector<8x2048xf32>
    %33 = arith.truncf %32 : vector<8x2048xf32> to vector<8x2048xbf16>
    %34 = vector.extract_strided_slice %33 {offsets = [0, 0], sizes = [4, 2048], strides = [1, 1]} : vector<8x2048xbf16> to vector<4x2048xbf16>
    %35 = vector.extract_strided_slice %33 {offsets = [4, 0], sizes = [4, 2048], strides = [1, 1]} : vector<8x2048xbf16> to vector<4x2048xbf16>
    %36 = vector.extract_strided_slice %34 {offsets = [0, 0], sizes = [4, 128], strides = [1, 1]} : vector<4x2048xbf16> to vector<4x128xbf16>
    %37 = vector.extract_strided_slice %35 {offsets = [0, 0], sizes = [4, 128], strides = [1, 1]} : vector<4x2048xbf16> to vector<4x128xbf16>
    %38 = vector.extract_strided_slice %34 {offsets = [0, 128], sizes = [4, 128], strides = [1, 1]} : vector<4x2048xbf16> to vector<4x128xbf16>
    %39 = vector.extract_strided_slice %35 {offsets = [0, 128], sizes = [4, 128], strides = [1, 1]} : vector<4x2048xbf16> to vector<4x128xbf16>
    %40 = vector.extract_strided_slice %34 {offsets = [0, 256], sizes = [4, 128], strides = [1, 1]} : vector<4x2048xbf16> to vector<4x128xbf16>
    %41 = vector.extract_strided_slice %35 {offsets = [0, 256], sizes = [4, 128], strides = [1, 1]} : vector<4x2048xbf16> to vector<4x128xbf16>
    %42 = vector.extract_strided_slice %34 {offsets = [0, 384], sizes = [4, 128], strides = [1, 1]} : vector<4x2048xbf16> to vector<4x128xbf16>
    %43 = vector.extract_strided_slice %35 {offsets = [0, 384], sizes = [4, 128], strides = [1, 1]} : vector<4x2048xbf16> to vector<4x128xbf16>
    %44 = vector.extract_strided_slice %34 {offsets = [0, 512], sizes = [4, 128], strides = [1, 1]} : vector<4x2048xbf16> to vector<4x128xbf16>
    %45 = vector.extract_strided_slice %35 {offsets = [0, 512], sizes = [4, 128], strides = [1, 1]} : vector<4x2048xbf16> to vector<4x128xbf16>
    %46 = vector.extract_strided_slice %34 {offsets = [0, 640], sizes = [4, 128], strides = [1, 1]} : vector<4x2048xbf16> to vector<4x128xbf16>
    %47 = vector.extract_strided_slice %35 {offsets = [0, 640], sizes = [4, 128], strides = [1, 1]} : vector<4x2048xbf16> to vector<4x128xbf16>
    %48 = vector.extract_strided_slice %34 {offsets = [0, 768], sizes = [4, 128], strides = [1, 1]} : vector<4x2048xbf16> to vector<4x128xbf16>
    %49 = vector.extract_strided_slice %35 {offsets = [0, 768], sizes = [4, 128], strides = [1, 1]} : vector<4x2048xbf16> to vector<4x128xbf16>
    %50 = vector.extract_strided_slice %34 {offsets = [0, 896], sizes = [4, 128], strides = [1, 1]} : vector<4x2048xbf16> to vector<4x128xbf16>
    %51 = vector.extract_strided_slice %35 {offsets = [0, 896], sizes = [4, 128], strides = [1, 1]} : vector<4x2048xbf16> to vector<4x128xbf16>
    %52 = vector.extract_strided_slice %34 {offsets = [0, 1024], sizes = [4, 128], strides = [1, 1]} : vector<4x2048xbf16> to vector<4x128xbf16>
    %53 = vector.extract_strided_slice %35 {offsets = [0, 1024], sizes = [4, 128], strides = [1, 1]} : vector<4x2048xbf16> to vector<4x128xbf16>
    %54 = vector.extract_strided_slice %34 {offsets = [0, 1152], sizes = [4, 128], strides = [1, 1]} : vector<4x2048xbf16> to vector<4x128xbf16>
    %55 = vector.extract_strided_slice %35 {offsets = [0, 1152], sizes = [4, 128], strides = [1, 1]} : vector<4x2048xbf16> to vector<4x128xbf16>
    %56 = vector.extract_strided_slice %34 {offsets = [0, 1280], sizes = [4, 128], strides = [1, 1]} : vector<4x2048xbf16> to vector<4x128xbf16>
    %57 = vector.extract_strided_slice %35 {offsets = [0, 1280], sizes = [4, 128], strides = [1, 1]} : vector<4x2048xbf16> to vector<4x128xbf16>
    %58 = vector.extract_strided_slice %34 {offsets = [0, 1408], sizes = [4, 128], strides = [1, 1]} : vector<4x2048xbf16> to vector<4x128xbf16>
    %59 = vector.extract_strided_slice %35 {offsets = [0, 1408], sizes = [4, 128], strides = [1, 1]} : vector<4x2048xbf16> to vector<4x128xbf16>
    %60 = vector.extract_strided_slice %34 {offsets = [0, 1536], sizes = [4, 128], strides = [1, 1]} : vector<4x2048xbf16> to vector<4x128xbf16>
    %61 = vector.extract_strided_slice %35 {offsets = [0, 1536], sizes = [4, 128], strides = [1, 1]} : vector<4x2048xbf16> to vector<4x128xbf16>
    %62 = vector.extract_strided_slice %34 {offsets = [0, 1664], sizes = [4, 128], strides = [1, 1]} : vector<4x2048xbf16> to vector<4x128xbf16>
    %63 = vector.extract_strided_slice %35 {offsets = [0, 1664], sizes = [4, 128], strides = [1, 1]} : vector<4x2048xbf16> to vector<4x128xbf16>
    %64 = vector.extract_strided_slice %34 {offsets = [0, 1792], sizes = [4, 128], strides = [1, 1]} : vector<4x2048xbf16> to vector<4x128xbf16>
    %65 = vector.extract_strided_slice %35 {offsets = [0, 1792], sizes = [4, 128], strides = [1, 1]} : vector<4x2048xbf16> to vector<4x128xbf16>
    %66 = vector.extract_strided_slice %34 {offsets = [0, 1920], sizes = [4, 128], strides = [1, 1]} : vector<4x2048xbf16> to vector<4x128xbf16>
    %67 = vector.extract_strided_slice %35 {offsets = [0, 1920], sizes = [4, 128], strides = [1, 1]} : vector<4x2048xbf16> to vector<4x128xbf16>
    %68 = tpu.concatenate %36, %37, %38, %39, %40, %41, %42, %43, %44, %45, %46, %47, %48, %49, %50, %51 in 1 : vector<4x128xbf16>, vector<4x128xbf16>, vector<4x128xbf16>, vector<4x128xbf16>, vector<4x128xbf16>, vector<4x128xbf16>, vector<4x128xbf16>, vector<4x128xbf16>, vector<4x128xbf16>, vector<4x128xbf16>, vector<4x128xbf16>, vector<4x128xbf16>, vector<4x128xbf16>, vector<4x128xbf16>, vector<4x128xbf16>, vector<4x128xbf16> -> vector<4x2048xbf16>
    %69 = tpu.concatenate %52, %53, %54, %55, %56, %57, %58, %59, %60, %61, %62, %63, %64, %65, %66, %67 in 1 : vector<4x128xbf16>, vector<4x128xbf16>, vector<4x128xbf16>, vector<4x128xbf16>, vector<4x128xbf16>, vector<4x128xbf16>, vector<4x128xbf16>, vector<4x128xbf16>, vector<4x128xbf16>, vector<4x128xbf16>, vector<4x128xbf16>, vector<4x128xbf16>, vector<4x128xbf16>, vector<4x128xbf16>, vector<4x128xbf16>, vector<4x128xbf16> -> vector<4x2048xbf16>
    %70 = tpu.concatenate %68, %69 in 1 : vector<4x2048xbf16>, vector<4x2048xbf16> -> vector<4x4096xbf16>
    %c0_33 = arith.constant 0 : index
    %c0_34 = arith.constant 0 : index
    %c0_35 = arith.constant 0 : index
    %71 = vector.load %arg4[%c0_33, %c0_34, %c0_35] : memref<1x4x4096xbf16, #tpu.memory_space<vmem>>, vector<1x4x4096xbf16>
    %72 = vector.shape_cast %71 : vector<1x4x4096xbf16> to vector<4x4096xbf16>
    %73 = vector.shape_cast %70 : vector<4x4096xbf16> to vector<1x4x4096xbf16>
    tpu.vector_store %arg4[%c0_33, %c0_34, %c0_35], %73 {strides = array<i32>} : memref<1x4x4096xbf16, #tpu.memory_space<vmem>>, vector<1x4x4096xbf16>,
    return
  }
  func.func @transform_0(%arg0: i32) -> (i32, i32, i32) {
    %c0_i32 = arith.constant 0 : i32
    %c0_i32_0 = arith.constant 0 : i32
    %c0_i32_1 = arith.constant 0 : i32
    return %arg0, %c0_i32, %c0_i32_0 : i32, i32, i32
  }
  func.func @transform_1(%arg0: i32) -> (i32, i32) {
    %c0_i32 = arith.constant 0 : i32
    %c0_i32_0 = arith.constant 0 : i32
    %c0_i32_1 = arith.constant 0 : i32
    return %c0_i32, %c0_i32_0 : i32, i32
  }
  func.func @transform_2(%arg0: i32) -> (i32, i32) {
    %c0_i32 = arith.constant 0 : i32
    %c0_i32_0 = arith.constant 0 : i32
    %c0_i32_1 = arith.constant 0 : i32
    return %c0_i32, %c0_i32_0 : i32, i32
  }
  func.func @transform_3(%arg0: i32) -> (i32, i32, i32) {
    %c0_i32 = arith.constant 0 : i32
    %c0_i32_0 = arith.constant 0 : i32
    %c0_i32_1 = arith.constant 0 : i32
    return %arg0, %c0_i32, %c0_i32_0 : i32, i32, i32
  }
}

</mosaic_0001>

<bundles_post_ra>
// kernel: upsample_forward.1
= control target key start
LH: loop header
LB: loop body
LE: loop exit
PB: predicated region body
PF: predicated region fallthrough
CT: control target
= control target key end

     0   :  { %s2319_s12 = smov 0   ;;  %s2895_s0 = inlined_call_operand.vmem [shape: bf16[2,4,2560], index: 0, kind: input, shape index: {}]   ;;  %s2896_s1 = inlined_call_operand.vmem [shape: bf16[8,36], index: 1, kind: input, shape index: {}]   ;;  %s2897_s2 = inlined_call_operand.vmem [shape: f32[8,1], index: 2, kind: input, shape index: {}]   ;;  %s2898_s3 = inlined_call_operand.vmem [shape: bf16[2,4,4096], index: 3, kind: output, shape index: {}]  }
   0x1 LB: > { %s2128_s13 = sadd.s32 4294967295, %s2293_s12   ;;  %p2132_p0 = scmp.ge.s32.totalorder %s2293_s12, 1  ;;  %s2293_s12 = sphi %s2319_s12, %s13_s12  }
   0x2   : > { %p137_p1 = scmp.lt.s32.totalorder %s2293_s12, 3 }
   0x4   : > { %p138_p2 = pnand %p2132_p0, %p137_p1 }
   0x5   : > { %p161_p3 = scmp.lt.s32.totalorder (!%p138_p2), %s2128_s13, 1  ;;  %s2296_s18 = smov (!%p138_p2), 127  }
   0x6   : > { %141 = sbr.rel (%p138_p2) target bundleno = 465 (0x1d1), region = 32  ;;  %s2297_s19 = smov (!%p138_p2), 1  }
   0xb   : > { %v186_v0 = vlaneseq  ;;  %v2295_v1 = vmov 1983009808   ;;  %s2900_s13 = smov (!%p161_p3, %s2128_s13), 1  ;;  %v2298_v56 = vmov 0   ;;  %vm276_vm0 = vcmask 1043456  }
   0xc   : > { %v184_v2 = vunpack.c.l.s4 %v2295_v1  ;;  %s2231_s14 = smul.u32 40, %s2900_s13  ;;  %1577 = vmatprep.mubr.bf16.mxu0 %v2298_v56  ;;  %1618 = vmatprep.mubr.bf16.mxu1 %v2298_v56  ;;  %vm499_vm1 = vcmask 1039360   ;;  %vm278_vm2 = vcmask 7168   ;;  %vm1496_vm3 = vcmask 1041408   ;;  %s2230_s24 = sshll.u32 %s2900_s13, 6 }
   0xd   : > { %v187_v3 = vshrl.u32 %v186_v0, 7  ;;  %2244 = vset.pattern.permute.xlu0 %v2298_v56  ;;  %vm1492_vm4 = vcmask 293888   ;;  %s2858_s27 = scalar_lea.vmem %s2898_s3, %s2230_s24 }
   0xe   : > { %v185_v4 = vunpack.c.0.s8 %v184_v2  ;;  %s2335_s17 = scalar_lea.vmem %s2895_s0, %s2231_s14 }
   0xf   : > { %v2338_v6 = vld [vmem:[%s2335_s17 + $0xe] sm:$0xff]  ;;  %v2341_v7 = vld [vmem:[%s2335_s17 + $0x6] sm:$0xff]  ;;  %v2358_v16 = vld [vmem:[%s2335_s17 + $0x16] sm:$0xff] }
  0x10   : > { %v2330_v5 = vsub.s32 %v185_v4, %v187_v3  ;;  %v752_v8 = vld [vmem:[%s2335_s17 + $0x4] sm:$0xff]  ;;  %v753_v11 = vld [vmem:[%s2335_s17 + $0xc] sm:$0xff]  ;;  %2156 = vst.sshfl [vmem:[#allocation2 + $0xc8] sm:$0xf0 pattern:$0x76325410] %v2341_v7  ;;  %v1119_v27 = vcombine.high %v2341_v7, %v2341_v7  ;;  %v1033_v41 = vcombine.low %v2341_v7, %v2341_v7  ;;  %v1134_v49 = vcombine.high %v2338_v6, %v2338_v6 }
  0x11   : > { %2146 = vst.sshfl [vmem:[#allocation2 + $0x80] sm:$0xf pattern:$0x76325410] %v752_v8  ;;  %v762_v12 = vcombine.low %v752_v8, %v752_v8  ;;  %v899_v13 = vcombine.high %v752_v8, %v752_v8  ;;  %v2352_v14 = vld [vmem:[%s2335_s17 + $0x2] sm:$0xff]  ;;  %v2355_v15 = vld [vmem:[%s2335_s17 + $0xa] sm:$0xff]  ;;  %v777_v18 = vcombine.low %v753_v11, %v753_v11  ;;  %v2396_v29 = vcombine.high %v753_v11, %v753_v11 }
  0x12   : > { %v1141_v9 = vrot.slane %v2338_v6, %v2330_v5  ;;  %v1126_v10 = vrot.slane %v2341_v7, %v2330_v5  ;;  %2158 = vst.sshfl [vmem:[#allocation2 + $0xd8] sm:$0xf0 pattern:$0x76325410] %v2338_v6  ;;  %v776_v17 = vrot.slane %v752_v8, %v2330_v5  ;;  %v2364_v19 = vld [vmem:[%s2335_s17 + $0x14] sm:$0xff]  ;;  %v2374_v22 = vld [vmem:[%s2335_s17 + $0x1e] sm:$0xff]  ;;  %v541_v24 = vcombine.low %v2352_v14, %v2352_v14 }
  0x13   : > { %2148 = vst.sshfl [vmem:[#allocation2 + $0x90] sm:$0xf pattern:$0x76325410] %v753_v11  ;;  %v769_v20 = vrot.slane %v762_v12, %v2330_v5  ;;  %v2371_v21 = vld [vmem:[%s2335_s17 + $0x12] sm:$0xff]  ;;  %v2377_v23 = vld [vmem:[%s2335_s17 + $0x1c] sm:$0xff]  ;;  %v556_v26 = vcombine.low %v2355_v15, %v2355_v15  ;;  %v784_v28 = vrot.slane %v777_v18, %v2330_v5  ;;  %v1133_v31 = vrot.slane %v1119_v27, %v2330_v5 }
  0x14   : > { %1190 = vrot.lane.b32.xlu1 %v1141_v9, %s2296_s18  ;;  %1186 = vrot.lane.b32.xlu0 %v1126_v10, %s2296_s18  ;;  %2138 = vst.sshfl [vmem:[#allocation2 + $0x8] sm:$0xf0 pattern:$0x76325410] %v2352_v14  ;;  %v2383_v25 = vld [vmem:[%s2335_s17 + $0x1a] sm:$0xff]  ;;  %v2400_v30 = vcombine.low %v2371_v21, %v2371_v21  ;;  %v913_v32 = vrot.slane %v899_v13, %v2330_v5  ;;  %v173_v39 = vld [vmem:[%s2335_s17 + $0x8] sm:$0xff] }
  0x15   : > { %2140 = vst.sshfl [vmem:[#allocation2 + $0x18] sm:$0xf0 pattern:$0x76325410] %v2355_v15  ;;  %v172_v33 = vld [vmem:[%s2335_s17] sm:$0xff]  ;;  %v2410_v34 = vcombine.high %v2364_v19, %v2364_v19  ;;  %v2415_v35 = vcombine.low %v2383_v25, %v2383_v25  ;;  %v921_v36 = vrot.slane %v753_v11, %v2330_v5  ;;  %v2425_v40 = vcombine.high %v2377_v23, %v2377_v23  ;;  %v174_v60 = vld [vmem:[%s2335_s17 + $0x10] sm:$0xff] }
  0x16   : > { %2160 = vst.sshfl [vmem:[#allocation2 + $0xe8] sm:$0xf0 pattern:$0x76325410] %v2358_v16  ;;  %v189_v37 = vrot.slane %v172_v33, %v2330_v5  ;;  %v182_v38 = vcombine.high %v172_v33, %v172_v33  ;;  %v204_v42 = vrot.slane %v173_v39, %v2330_v5  ;;  %v404_v44 = vcombine.high %v2352_v14, %v2352_v14 }
  0x17   : > { %2147 = vst.sshfl [vmem:[#allocation2 + $0x88] sm:$0xf pattern:$0x76325410] %v899_v13  ;;  %v411_v46 = vrot.slane %v2352_v14, %v2330_v5  ;;  %v548_v47 = vrot.slane %v541_v24, %v2330_v5  ;;  %v426_v48 = vrot.slane %v2355_v15, %v2330_v5  ;;  %v563_v50 = vrot.slane %v556_v26, %v2330_v5  ;;  %v175_v13 = vld [vmem:[%s2335_s17 + $0x18] sm:$0xff] }
  0x18   : > { %2150 = vst.sshfl [vmem:[#allocation2 + $0xa0] sm:$0xf pattern:$0x76325410] %v2364_v19  ;;  %832 = vrot.lane.b32.xlu0 %v776_v17, %s2296_s18  ;;  %830 = vrot.lane.b32.xlu1 %v769_v20, %s2296_s18  ;;  %v196_v43 = vrot.slane %v182_v38, %v2330_v5  ;;  %v418_v45 = vrot.slane %v404_v44, %v2330_v5 }
  0x19   : > { %2142 = vst.sshfl [vmem:[#allocation2 + $0x28] sm:$0xf0 pattern:$0x76325410] %v2371_v21  ;;  %v1156_v51 = vrot.slane %v2358_v16, %v2330_v5  ;;  %v1148_v52 = vrot.slane %v1134_v49, %v2330_v5  ;;  %v792_v53 = vcombine.low %v2364_v19, %v2364_v19  ;;  %v1048_v54 = vcombine.low %v2338_v6, %v2338_v6 }
  0x1a   : > { %2152 = vst.sshfl [vmem:[#allocation2 + $0xb0] sm:$0xf pattern:$0x76325410] %v2377_v23  ;;  %v936_v57 = vrot.slane %v2364_v19, %v2330_v5  ;;  %v928_v58 = vrot.slane %v2396_v29, %v2330_v5  ;;  %v197_v59 = vcombine.high %v173_v39, %v173_v39  ;;  %v219_v61 = vrot.slane %v174_v60, %v2330_v5 }
  0x1b   : > { %2162 = vst.sshfl [vmem:[#allocation2 + $0xf8] sm:$0xf0 pattern:$0x76325410] %v2374_v22  ;;  %v799_v55 = vrot.slane %v792_v53, %v2330_v5  ;;  %v419_v63 = vcombine.high %v2355_v15, %v2355_v15  ;;  %v441_v0 = vrot.slane %v2371_v21, %v2330_v5  ;;  %v578_v2 = vrot.slane %v2400_v30, %v2330_v5 }
  0x1c   : > { %2144 = vst.sshfl [vmem:[#allocation2 + $0x38] sm:$0xf0 pattern:$0x76325410] %v2383_v25  ;;  %966 = vrot.lane.b32.xlu0 %v776_v17, %s2297_s19  ;;  %834 = vrot.lane.b32.xlu1 %v784_v28, %s2296_s18  ;;  %v211_v62 = vrot.slane %v197_v59, %v2330_v5  ;;  %v1149_v3 = vcombine.high %v2358_v16, %v2358_v16 }
  0x1d   : > { %2137 = vst.sshfl [vmem:[#allocation2] sm:$0xf0 pattern:$0x76325410] %v541_v24  ;;  %v433_v1 = vrot.slane %v419_v63, %v2330_v5  ;;  %v1171_v4 = vrot.slane %v2374_v22, %v2330_v5  ;;  %v807_v7 = vcombine.low %v2377_v23, %v2377_v23  ;;  %v1063_v8 = vcombine.low %v2358_v16, %v2358_v16 }
  0x1e   : > { %2139 = vst.sshfl [vmem:[#allocation2 + $0x10] sm:$0xf0 pattern:$0x76325410] %v556_v26  ;;  %v1163_v6 = vrot.slane %v1149_v3, %v2330_v5  ;;  %v951_v10 = vrot.slane %v2377_v23, %v2330_v5  ;;  %v943_v11 = vrot.slane %v2410_v34, %v2330_v5  ;;  %v212_v12 = vcombine.high %v174_v60, %v174_v60 }
  0x1f   : > { %2149 = vst.sshfl [vmem:[#allocation2 + $0x98] sm:$0xf pattern:$0x76325410] %v2396_v29  ;;  %v814_v9 = vrot.slane %v807_v7, %v2330_v5  ;;  %v234_v14 = vrot.slane %v175_v13, %v2330_v5  ;;  %v434_v16 = vcombine.high %v2371_v21, %v2371_v21  ;;  %v456_v17 = vrot.slane %v2383_v25, %v2330_v5 }
  0x20   : > { %2141 = vst.sshfl [vmem:[#allocation2 + $0x20] sm:$0xf0 pattern:$0x76325410] %v2400_v30  ;;  %1188 = vrot.lane.b32.xlu0 %v1133_v31, %s2296_s18  ;;  %968 = vrot.lane.b32.xlu1 %v913_v32, %s2297_s19  ;;  %v226_v15 = vrot.slane %v212_v12, %v2330_v5  ;;  %v593_v19 = vrot.slane %v2415_v35, %v2330_v5 }
  0x21   : > { %2151 = vst.sshfl [vmem:[#allocation2 + $0xa8] sm:$0xf pattern:$0x76325410] %v2410_v34  ;;  %v448_v18 = vrot.slane %v434_v16, %v2330_v5  ;;  %v1164_v20 = vcombine.high %v2374_v22, %v2374_v22  ;;  %v1078_v26 = vcombine.low %v2374_v22, %v2374_v22  ;;  %v958_v28 = vrot.slane %v2425_v40, %v2330_v5 }
  0x22   : > { %2143 = vst.sshfl [vmem:[#allocation2 + $0x30] sm:$0xf0 pattern:$0x76325410] %v2415_v35  ;;  %v227_v29 = vcombine.high %v175_v13, %v175_v13  ;;  %v449_v31 = vcombine.high %v2383_v25, %v2383_v25  ;;  %v1286_v25 = vld [vmem:[%s2897_s2] sm:$0xff] }
  0x23   : > { %2153 = vst.sshfl [vmem:[#allocation2 + $0xb8] sm:$0xf pattern:$0x76325410] %v2425_v40  ;;  %v1178_v21 = vrot.slane %v1164_v20, %v2330_v5 }
  0x24   : > { %970 = vrot.lane.b32.xlu0 %v921_v36, %s2297_s19  ;;  %249 = vrot.lane.b32.xlu1 %v189_v37, %s2297_s19  ;;  %2155 = vst.sshfl [vmem:[#allocation2 + $0xc0] sm:$0xf0 pattern:$0x76325410] %v1033_v41  ;;  %v241_v22 = vrot.slane %v227_v29, %v2330_v5  ;;  %v463_v33 = vrot.slane %v449_v31, %v2330_v5 }
  0x25   : > { %2157 = vst.sshfl [vmem:[#allocation2 + $0xd0] sm:$0xf0 pattern:$0x76325410] %v1048_v54 }
  0x26   : > { %2159 = vst.sshfl [vmem:[#allocation2 + $0xe0] sm:$0xf0 pattern:$0x76325410] %v1063_v8 }
  0x27   : > { %v2266_v23 = vld [vmem:[%s2335_s17 + $0x24] ss:$0 sps:$4 sm:$0x33]   ;;  %v2270_v34 = vld [vmem:[%s2335_s17 + $0x22] ss:$0 sps:$4 sm:$0x33]  }
  0x28   : > { %253 = vrot.lane.b32.xlu1 %v204_v42, %s2297_s19  ;;  %251 = vrot.lane.b32.xlu0 %v196_v43, %s2297_s19  ;;  %v2163_v24 = vld.sshfl [vmem:[%s2335_s17 + $0x26] sm:$0x3 pattern:$0x76325410]  ;;  %v829_v27 = vrot.slane %v2266_v23, %v2330_v5 }
  0x29   : > { %2161 = vst.sshfl [vmem:[#allocation2 + $0xf0] sm:$0xf0 pattern:$0x76325410] %v1078_v26 }
  0x2a   : > { %v2154_v30 = vld.sshfl [vmem:[%s2335_s17 + $0x24] sm:$0x3 pattern:$0x76325410] }
  0x2b   : > { %v2136_v32 = vld.sshfl [vmem:[%s2335_s17 + $0x20] sm:$0x3 pattern:$0x76325410] }
  0x2c   : > { %473 = vrot.lane.b32.xlu1 %v418_v45, %s2296_s18  ;;  %471 = vrot.lane.b32.xlu0 %v411_v46, %s2296_s18  ;;  %v2145_v35 = vld.sshfl [vmem:[%s2335_s17 + $0x22] sm:$0x3 pattern:$0x76325410] }
  0x30   : > { %609 = vrot.lane.b32.xlu1 %v548_v47, %s2297_s19  ;;  %475 = vrot.lane.b32.xlu0 %v426_v48, %s2296_s18 }
  0x34   : > { %613 = vrot.lane.b32.xlu1 %v563_v50, %s2297_s19  ;;  %611 = vrot.lane.b32.xlu0 %v411_v46, %s2297_s19 }
  0x38   : > { %1194 = vrot.lane.b32.xlu1 %v1156_v51, %s2296_s18  ;;  %1192 = vrot.lane.b32.xlu0 %v1148_v52, %s2296_s18 }
  0x3c   : > { %838 = vrot.lane.b32.xlu1 %v799_v55, %s2296_s18  ;;  %836 = vrot.lane.b32.xlu0 %v921_v36, %s2296_s18  ;;  %v608_v36 = vrot.slane %v2270_v34, %v2330_v5 }
  0x40   : > { %974 = vrot.lane.b32.xlu1 %v936_v57, %s2297_s19  ;;  %972 = vrot.lane.b32.xlu0 %v928_v58, %s2297_s19 }
  0x44   : > { %257 = vrot.lane.b32.xlu1 %v219_v61, %s2297_s19  ;;  %255 = vrot.lane.b32.xlu0 %v211_v62, %s2297_s19 }
  0x48   : > { %479 = vrot.lane.b32.xlu1 %v441_v0, %s2296_s18  ;;  %477 = vrot.lane.b32.xlu0 %v433_v1, %s2296_s18 }
  0x4c   : > { %617 = vrot.lane.b32.xlu1 %v578_v2, %s2297_s19  ;;  %615 = vrot.lane.b32.xlu0 %v426_v48, %s2297_s19 }
  0x50   : > { %1198 = vrot.lane.b32.xlu1 %v1171_v4, %s2296_s18  ;;  %1196 = vrot.lane.b32.xlu0 %v1163_v6, %s2296_s18 }
  0x54   : > { %842 = vrot.lane.b32.xlu1 %v814_v9, %s2296_s18  ;;  %840 = vrot.lane.b32.xlu0 %v936_v57, %s2296_s18 }
  0x58   : > { %978 = vrot.lane.b32.xlu1 %v951_v10, %s2297_s19  ;;  %976 = vrot.lane.b32.xlu0 %v943_v11, %s2297_s19 }
  0x5c   : > { %261 = vrot.lane.b32.xlu1 %v234_v14, %s2297_s19  ;;  %259 = vrot.lane.b32.xlu0 %v226_v15, %s2297_s19 }
  0x60   : > { %483 = vrot.lane.b32.xlu1 %v456_v17, %s2296_s18  ;;  %481 = vrot.lane.b32.xlu0 %v448_v18, %s2296_s18 }
  0x64   : > { %621 = vrot.lane.b32.xlu1 %v593_v19, %s2297_s19  ;;  %619 = vrot.lane.b32.xlu0 %v441_v0, %s2297_s19 }
  0x68   : > { %1202 = vrot.lane.b32.xlu1 %v2163_v24, %s2296_s18  ;;  %1200 = vrot.lane.b32.xlu0 %v1178_v21, %s2296_s18 }
  0x6c   : > { %846 = vrot.lane.b32.xlu1 %v829_v27, %s2296_s18  ;;  %844 = vrot.lane.b32.xlu0 %v951_v10, %s2296_s18 }
  0x70   : > { %982 = vrot.lane.b32.xlu1 %v2154_v30, %s2297_s19  ;;  %980 = vrot.lane.b32.xlu0 %v958_v28, %s2297_s19 }
  0x74   : > { %265 = vrot.lane.b32.xlu1 %v2136_v32, %s2297_s19  ;;  %263 = vrot.lane.b32.xlu0 %v241_v22, %s2297_s19 }
  0x78   : > { %487 = vrot.lane.b32.xlu1 %v2145_v35, %s2296_s18  ;;  %485 = vrot.lane.b32.xlu0 %v463_v33, %s2296_s18 }
  0x7c   : > { %625 = vrot.lane.b32.xlu1 %v608_v36, %s2297_s19  ;;  %623 = vrot.lane.b32.xlu0 %v456_v17, %s2297_s19 }
  0x80   : > { %1289 = vperm.xlu0 %2244, %v1286_v25  }
  0x86   : > { %v2561_v37 = vpop.permute.xlu1 %1190  ;;  %v1187_v38 = vpop.permute.xlu0 %1186 }
  0x87   : > { %v1206_v49 = vrot.slane %v2561_v37, 4  ;;  %v1204_v53 = vrot.slane %v1187_v38, 4 }
  0x8a   : > { %v833_v39 = vpop.permute.xlu0 %832  ;;  %v831_v40 = vpop.permute.xlu1 %830 }
  0x8b   : > { %v849_v41 = vrot.slane %v833_v39, 4  ;;  %v848_v42 = vrot.slane %v831_v40, 4 }
  0x8d   : > { %v857_v43 = vsel %vm276_vm0, %v848_v42, %v849_v41 }
  0x8e   : > { %v858_v44 = vsel %vm499_vm1, %v831_v40, %v857_v43  ;;  %v967_v45 = vpop.permute.xlu0 %966  ;;  %v2565_v46 = vpop.permute.xlu1 %834 }
  0x8f   : > { %881 = vst [vmem:[#allocation2 + $0x80] sm:$0xcc] %v858_v44  ;;  %v850_v47 = vrot.slane %v2565_v46, 4  ;;  %v984_v54 = vrot.slane %v967_v45, 4 }
  0x91   : > { %v859_v48 = vsel %vm276_vm0, %v849_v41, %v850_v47 }
  0x92   : > { %v860_v50 = vsel %vm499_vm1, %v833_v39, %v859_v48  ;;  %v1189_v51 = vpop.permute.xlu0 %1188  ;;  %v969_v52 = vpop.permute.xlu1 %968 }
  0x93   : > { %882 = vst [vmem:[#allocation2 + $0x88] sm:$0xcc] %v860_v50  ;;  %v1205_v55 = vrot.slane %v1189_v51, 4  ;;  %v985_v57 = vrot.slane %v969_v52, 4 }
  0x95   : > { %v1213_v58 = vsel %vm276_vm0, %v1204_v53, %v1205_v55  ;;  %v1215_v59 = vsel %vm276_vm0, %v1205_v55, %v1206_v49  ;;  %v993_v60 = vsel %vm276_vm0, %v984_v54, %v985_v57 }
  0x96   : > { %v1214_v61 = vsel %vm499_vm1, %v1187_v38, %v1213_v58  ;;  %v1216_v62 = vsel %vm499_vm1, %v1189_v51, %v1215_v59  ;;  %v994_v63 = vsel %vm278_vm2, %v967_v45, %v993_v60  ;;  %v2581_v0 = vpop.permute.xlu0 %970  ;;  %v250_v1 = vpop.permute.xlu1 %249  ;;  %v1262_v29 = vld [vmem:[#allocation2 + $0x80] sm:$0xff] }
  0x97   : > { %1237 = vst [vmem:[#allocation2 + $0x100] sm:$0x33] %v1214_v61  ;;  %1238 = vst [vmem:[#allocation2 + $0x108] sm:$0x33] %v1216_v62  ;;  %v986_v2 = vrot.slane %v2581_v0, 4  ;;  %v267_v8 = vrot.slane %v250_v1, 4 }
  0x98   : > { %1017 = vst [vmem:[#allocation2 + $0xc0] sm:$0x33] %v994_v63 }
  0x99   : > { %v995_v3 = vsel %vm276_vm0, %v985_v57, %v986_v2 }
  0x9a   : > { %v996_v4 = vsel %vm278_vm2, %v969_v52, %v995_v3  ;;  %v2588_v6 = vpop.permute.xlu1 %253  ;;  %v252_v7 = vpop.permute.xlu0 %251  ;;  %v1263_v35 = vld [vmem:[#allocation2 + $0x88] sm:$0xff] }
  0x9b   : > { %1018 = vst [vmem:[#allocation2 + $0xc8] sm:$0x33] %v996_v4  ;;  %v269_v9 = vrot.slane %v2588_v6, 4  ;;  %v268_v10 = vrot.slane %v252_v7, 4 }
  0x9d   : > { %v277_v11 = vsel %vm276_vm0, %v267_v8, %v268_v10  ;;  %v280_v12 = vsel %vm276_vm0, %v268_v10, %v269_v9 }
  0x9e   : > { %v279_v13 = vsel %vm278_vm2, %v250_v1, %v277_v11  ;;  %v281_v14 = vsel %vm278_vm2, %v252_v7, %v280_v12  ;;  %v474_v15 = vpop.permute.xlu1 %473  ;;  %v472_v16 = vpop.permute.xlu0 %471  ;;  %v1278_v17 = vld [vmem:[#allocation2 + $0x100] sm:$0x33]  ;;  %v1279_v18 = vld [vmem:[#allocation2 + $0x108] sm:$0x33] }
  0x9f   : > { %302 = vst [vmem:[#allocation2] sm:$0x33] %v279_v13  ;;  %303 = vst [vmem:[#allocation2 + $0x8] sm:$0x33] %v281_v14  ;;  %v490_v19 = vrot.slane %v474_v15, 4  ;;  %v489_v20 = vrot.slane %v472_v16, 4  ;;  %v2197_v21 = vcombine.high %v1278_v17, %v1278_v17  ;;  %v2199_v23 = vcombine.high %v1279_v18, %v1279_v18 }
  0xa0   : > { %v1270_v24 = vld [vmem:[#allocation2 + $0xc0] sm:$0xff]  ;;  %v2196_v26 = vcombine.low %v1278_v17, %v1278_v17  ;;  %v2198_v27 = vcombine.low %v1279_v18, %v1279_v18 }
  0xa1   : > { %v498_v28 = vsel %vm276_vm0, %v489_v20, %v490_v19  ;;  %2212 = vmatprep.subr.msk.bf16.mxu0 %vm1496_vm3, %v2197_v21  ;;  %2214 = vmatprep.subr.msk.bf16.mxu1 %vm1496_vm3, %v2199_v23  ;;  %v2181_v34 = vcombine.high %v1262_v29, %v1270_v24  ;;  %v2180_v41 = vcombine.low %v1262_v29, %v1270_v24 }
  0xa2   : > { %v500_v30 = vsel %vm499_vm1, %v472_v16, %v498_v28  ;;  %v1498_v22 = vsel %vm1496_vm3, %v2196_v26, 0  ;;  %v1504_v31 = vsel %vm1496_vm3, %v2198_v27, 0  ;;  %v610_v32 = vpop.permute.xlu1 %609  ;;  %v2603_v33 = vpop.permute.xlu0 %475  ;;  %v1271_v36 = vld [vmem:[#allocation2 + $0xc8] sm:$0xff] }
  0xa3   : > { %523 = vst [vmem:[#allocation2 + $0x40] sm:$0x33] %v500_v30  ;;  %1556 = vmatpush1.bf16.msra.mxu0 %v1498_v22  ;;  %1597 = vmatpush1.bf16.msra.mxu1 %v1504_v31  ;;  %v491_v25 = vrot.slane %v2603_v33, 4  ;;  %v2183_v38 = vcombine.high %v1263_v35, %v1271_v36  ;;  %v2182_v39 = vcombine.low %v1263_v35, %v1271_v36  ;;  %v627_v45 = vrot.slane %v610_v32, 4 }
  0xa4   : > { %1557 = vmatprep.subr.bf16.mxu0 %v2181_v34 }
  0xa5   : > { %v501_v40 = vsel %vm276_vm0, %v490_v19, %v491_v25  ;;  %1598 = vmatprep.subr.bf16.mxu1 %v2183_v38 }
  0xa6   : > { %v502_v42 = vsel %vm499_vm1, %v474_v15, %v501_v40  ;;  %v2610_v43 = vpop.permute.xlu1 %613  ;;  %v612_v44 = vpop.permute.xlu0 %611  ;;  %v1246_v10 = vld [vmem:[#allocation2] sm:$0xff]  ;;  %v1247_v15 = vld [vmem:[#allocation2 + $0x8] sm:$0xff] }
  0xa7   : > { %524 = vst [vmem:[#allocation2 + $0x48] sm:$0x33] %v502_v42  ;;  %1558 = vmatpush1.bf16.msra.mxu0 %v2180_v41  ;;  %1599 = vmatpush1.bf16.msra.mxu1 %v2182_v39  ;;  %v629_v48 = vrot.slane %v2610_v43, 4  ;;  %v628_v50 = vrot.slane %v612_v44, 4 }
  0xa9   : > { %v636_v51 = vsel %vm276_vm0, %v627_v45, %v628_v50  ;;  %v638_v52 = vsel %vm276_vm0, %v628_v50, %v629_v48 }
  0xaa   : > { %v637_v53 = vsel %vm278_vm2, %v610_v32, %v636_v51  ;;  %v639_v54 = vsel %vm278_vm2, %v612_v44, %v638_v52  ;;  %v2619_v55 = vpop.permute.xlu1 %1194  ;;  %v1193_v57 = vpop.permute.xlu0 %1192 }
  0xab   : > { %660 = vst [vmem:[#allocation2 + $0x40] sm:$0xcc] %v637_v53  ;;  %661 = vst [vmem:[#allocation2 + $0x48] sm:$0xcc] %v639_v54  ;;  %v1208_v58 = vrot.slane %v2619_v55, 4  ;;  %v1207_v59 = vrot.slane %v1193_v57, 4 }
  0xad   : > { %v1217_v60 = vsel %vm276_vm0, %v1206_v49, %v1207_v59  ;;  %v1219_v61 = vsel %vm276_vm0, %v1207_v59, %v1208_v58 }
  0xae   : > { %v1218_v62 = vsel %vm499_vm1, %v2561_v37, %v1217_v60  ;;  %v1220_v63 = vsel %vm499_vm1, %v1193_v57, %v1219_v61  ;;  %v2631_v1 = vpop.permute.xlu1 %838  ;;  %v837_v3 = vpop.permute.xlu0 %836 }
  0xaf   : > { %1239 = vst [vmem:[#allocation2 + $0x110] sm:$0x33] %v1218_v62  ;;  %1240 = vst [vmem:[#allocation2 + $0x118] sm:$0x33] %v1220_v63  ;;  %v852_v4 = vrot.slane %v2631_v1, 4  ;;  %v851_v7 = vrot.slane %v837_v3, 4 }
  0xb1   : > { %v861_v49 = vsel %vm276_vm0, %v850_v47, %v851_v7  ;;  %v863_v8 = vsel %vm276_vm0, %v851_v7, %v852_v4 }
  0xb2   : > { %v862_v37 = vsel %vm499_vm1, %v2565_v46, %v861_v49  ;;  %v864_v11 = vsel %vm499_vm1, %v837_v3, %v863_v8  ;;  %v2643_v12 = vpop.permute.xlu1 %974  ;;  %v973_v13 = vpop.permute.xlu0 %972  ;;  %v1254_v14 = vld [vmem:[#allocation2 + $0x40] sm:$0xff]  ;;  %v1255_v16 = vld [vmem:[#allocation2 + $0x48] sm:$0xff] }
  0xb3   : > { %883 = vst [vmem:[#allocation2 + $0x90] sm:$0xcc] %v862_v37  ;;  %884 = vst [vmem:[#allocation2 + $0x98] sm:$0xcc] %v864_v11  ;;  %v988_v47 = vrot.slane %v2643_v12, 4  ;;  %v987_v17 = vrot.slane %v973_v13, 4  ;;  %v2165_v18 = vcombine.high %v1246_v10, %v1254_v14  ;;  %v2167_v19 = vcombine.high %v1247_v15, %v1255_v16 }
  0xb4   : > { %v2164_v20 = vcombine.low %v1246_v10, %v1254_v14  ;;  %v2166_v21 = vcombine.low %v1247_v15, %v1255_v16 }
  0xb5   : > { %v997_v46 = vsel %vm276_vm0, %v986_v2, %v987_v17  ;;  %v999_v23 = vsel %vm276_vm0, %v987_v17, %v988_v47  ;;  %1559 = vmatprep.subr.bf16.mxu0 %v2165_v18  ;;  %1600 = vmatprep.subr.bf16.mxu1 %v2167_v19 }
  0xb6   : > { %v998_v24 = vsel %vm278_vm2, %v2581_v0, %v997_v46  ;;  %v1000_v26 = vsel %vm278_vm2, %v973_v13, %v999_v23  ;;  %v2655_v27 = vpop.permute.xlu1 %257  ;;  %1560 = vmatpush1.bf16.msra.mxu0 %v2164_v20  ;;  %1601 = vmatpush1.bf16.msra.mxu1 %v2166_v21  ;;  %v256_v28 = vpop.permute.xlu0 %255  ;;  %v1280_v29 = vld [vmem:[#allocation2 + $0x110] sm:$0x33]  ;;  %v1281_v30 = vld [vmem:[#allocation2 + $0x118] sm:$0x33]  ;;  %v2661_v0 = vld [vmem:[%s2896_s1] sm:$0xf] }
  0xb7   : > { %1019 = vst [vmem:[#allocation2 + $0xd0] sm:$0x33] %v998_v24  ;;  %1020 = vst [vmem:[#allocation2 + $0xd8] sm:$0x33] %v1000_v26  ;;  %v271_v2 = vrot.slane %v2655_v27, 4  ;;  %v270_v22 = vrot.slane %v256_v28, 4  ;;  %v2201_v31 = vcombine.high %v1280_v29, %v1280_v29  ;;  %v2203_v32 = vcombine.high %v1281_v30, %v1281_v30 }
  0xb8   : > { %v2200_v34 = vcombine.low %v1280_v29, %v1280_v29  ;;  %v2202_v35 = vcombine.low %v1281_v30, %v1281_v30 }
  0xb9   : > { %v282_v36 = vsel %vm276_vm0, %v269_v9, %v270_v22  ;;  %v284_v38 = vsel %vm276_vm0, %v270_v22, %v271_v2  ;;  %2216 = vmatprep.subr.msk.bf16.mxu0 %vm1496_vm3, %v2201_v31  ;;  %2218 = vmatprep.subr.msk.bf16.mxu1 %vm1496_vm3, %v2203_v32 }
  0xba   : > { %v283_v39 = vsel %vm278_vm2, %v2588_v6, %v282_v36  ;;  %v285_v40 = vsel %vm278_vm2, %v256_v28, %v284_v38  ;;  %v2674_v41 = vpop.permute.xlu1 %479  ;;  %2213 = vmatmul.mubr.msk.bf16.vlgmr.msra.gmra.mxu0 %vm1492_vm4, %v2661_v0  ;;  %2215 = vmatmul.mubr.msk.bf16.vlgmr.msra.gmra.mxu1 %vm1492_vm4, %v2661_v0  ;;  %v1510_v9 = vsel %vm1496_vm3, %v2200_v34, 0  ;;  %v1516_v42 = vsel %vm1496_vm3, %v2202_v35, 0  ;;  %v478_v44 = vpop.permute.xlu0 %477  ;;  %v1264_v59 = vld [vmem:[#allocation2 + $0x90] sm:$0xff]  ;;  %v1265_v7 = vld [vmem:[#allocation2 + $0x98] sm:$0xff] }
  0xbb   : > { %304 = vst [vmem:[#allocation2 + $0x10] sm:$0x33] %v283_v39  ;;  %305 = vst [vmem:[#allocation2 + $0x18] sm:$0x33] %v285_v40  ;;  %v493_v45 = vrot.slane %v2674_v41, 4  ;;  %1638 = vmatpush1.bf16.msra.mxu0 %v1510_v9  ;;  %1679 = vmatpush1.bf16.msra.mxu1 %v1516_v42  ;;  %v492_v6 = vrot.slane %v478_v44, 4 }
  0xbc   : > { %1659 = vmatprep.mubr.bf16.mxu0 %v2298_v56  ;;  %1700 = vmatprep.mubr.bf16.mxu1 %v2298_v56 }
  0xbd   : > { %v503_v50 = vsel %vm276_vm0, %v491_v25, %v492_v6  ;;  %v505_v51 = vsel %vm276_vm0, %v492_v6, %v493_v45 }
  0xbe   : > { %v504_v52 = vsel %vm499_vm1, %v2603_v33, %v503_v50  ;;  %v506_v53 = vsel %vm499_vm1, %v478_v44, %v505_v51  ;;  %v2694_v54 = vpop.permute.xlu1 %617  ;;  %v616_v57 = vpop.permute.xlu0 %615  ;;  %v1272_v60 = vld [vmem:[#allocation2 + $0xd0] sm:$0xff]  ;;  %v1273_v61 = vld [vmem:[#allocation2 + $0xd8] sm:$0xff] }
  0xbf   : > { %525 = vst [vmem:[#allocation2 + $0x50] sm:$0x33] %v504_v52  ;;  %526 = vst [vmem:[#allocation2 + $0x58] sm:$0x33] %v506_v53  ;;  %v631_v62 = vrot.slane %v2694_v54, 4  ;;  %v630_v25 = vrot.slane %v616_v57, 4  ;;  %v2184_v63 = vcombine.low %v1264_v59, %v1272_v60  ;;  %v2185_v3 = vcombine.high %v1264_v59, %v1272_v60 }
  0xc0   : > { %v2186_v49 = vcombine.low %v1265_v7, %v1273_v61  ;;  %v2187_v8 = vcombine.high %v1265_v7, %v1273_v61 }
  0xc1   : > { %v640_v33 = vsel %vm276_vm0, %v629_v48, %v630_v25  ;;  %v642_v10 = vsel %vm276_vm0, %v630_v25, %v631_v62  ;;  %1639 = vmatprep.subr.bf16.mxu0 %v2185_v3 }
  0xc2   : > { %v641_v37 = vsel %vm278_vm2, %v2610_v43, %v640_v33  ;;  %v643_v11 = vsel %vm278_vm2, %v616_v57, %v642_v10  ;;  %1680 = vmatprep.subr.bf16.mxu1 %v2187_v8  ;;  %v2706_v13 = vpop.permute.xlu1 %1198  ;;  %1640 = vmatpush1.bf16.msra.mxu0 %v2184_v63  ;;  %v1197_v14 = vpop.permute.xlu0 %1196  ;;  %v1248_v29 = vld [vmem:[#allocation2 + $0x10] sm:$0xff]  ;;  %v1249_v35 = vld [vmem:[#allocation2 + $0x18] sm:$0xff] }
  0xc3   : > { %662 = vst [vmem:[#allocation2 + $0x50] sm:$0xcc] %v641_v37  ;;  %663 = vst [vmem:[#allocation2 + $0x58] sm:$0xcc] %v643_v11  ;;  %v1210_v15 = vrot.slane %v2706_v13, 4  ;;  %1681 = vmatpush1.bf16.msra.mxu1 %v2186_v49  ;;  %v1209_v48 = vrot.slane %v1197_v14, 4 }
  0xc5   : > { %v1221_v16 = vsel %vm276_vm0, %v1208_v58, %v1209_v48  ;;  %v1223_v43 = vsel %vm276_vm0, %v1209_v48, %v1210_v15 }
  0xc6   : > { %v1222_v17 = vsel %vm499_vm1, %v2619_v55, %v1221_v16  ;;  %v1224_v18 = vsel %vm499_vm1, %v1197_v14, %v1223_v43  ;;  %v2718_v19 = vpop.permute.xlu1 %842  ;;  %v841_v20 = vpop.permute.xlu0 %840 }
  0xc7   : > { %1241 = vst [vmem:[#allocation2 + $0x120] sm:$0x33] %v1222_v17  ;;  %1242 = vst [vmem:[#allocation2 + $0x128] sm:$0x33] %v1224_v18  ;;  %v854_v21 = vrot.slane %v2718_v19, 4  ;;  %v853_v46 = vrot.slane %v841_v20, 4 }
  0xc9   : > { %v865_v58 = vsel %vm276_vm0, %v852_v4, %v853_v46  ;;  %v867_v23 = vsel %vm276_vm0, %v853_v46, %v854_v21 }
  0xca   : > { %v866_v55 = vsel %vm499_vm1, %v2631_v1, %v865_v58  ;;  %v868_v24 = vsel %vm499_vm1, %v841_v20, %v867_v23  ;;  %v2730_v26 = vpop.permute.xlu1 %978  ;;  %v977_v28 = vpop.permute.xlu0 %976  ;;  %v1256_v30 = vld [vmem:[#allocation2 + $0x50] sm:$0xff]  ;;  %v1257_v22 = vld [vmem:[#allocation2 + $0x58] sm:$0xff] }
  0xcb   : > { %885 = vst [vmem:[#allocation2 + $0xa0] sm:$0xcc] %v866_v55  ;;  %886 = vst [vmem:[#allocation2 + $0xa8] sm:$0xcc] %v868_v24  ;;  %v990_v31 = vrot.slane %v2730_v26, 4  ;;  %v989_v4 = vrot.slane %v977_v28, 4  ;;  %v2168_v32 = vcombine.low %v1248_v29, %v1256_v30  ;;  %v2169_v34 = vcombine.high %v1248_v29, %v1256_v30 }
  0xcc   : > { %v2170_v36 = vcombine.low %v1249_v35, %v1257_v22  ;;  %v2171_v38 = vcombine.high %v1249_v35, %v1257_v22 }
  0xcd   : > { %v1001_v1 = vsel %vm276_vm0, %v988_v47, %v989_v4  ;;  %v1003_v39 = vsel %vm276_vm0, %v989_v4, %v990_v31  ;;  %1641 = vmatprep.subr.bf16.mxu0 %v2169_v34 }
  0xce   : > { %v1002_v40 = vsel %vm278_vm2, %v2643_v12, %v1001_v1  ;;  %v1004_v9 = vsel %vm278_vm2, %v977_v28, %v1003_v39  ;;  %1682 = vmatprep.subr.bf16.mxu1 %v2171_v38  ;;  %v2742_v42 = vpop.permute.xlu1 %261  ;;  %1642 = vmatpush1.bf16.msra.mxu0 %v2168_v32  ;;  %v260_v44 = vpop.permute.xlu0 %259  ;;  %v1282_v6 = vld [vmem:[#allocation2 + $0x120] sm:$0x33]  ;;  %v1283_v50 = vld [vmem:[#allocation2 + $0x128] sm:$0x33] }
  0xcf   : > { %1021 = vst [vmem:[#allocation2 + $0xe0] sm:$0x33] %v1002_v40  ;;  %1022 = vst [vmem:[#allocation2 + $0xe8] sm:$0x33] %v1004_v9  ;;  %v273_v47 = vrot.slane %v2742_v42, 4  ;;  %1683 = vmatpush1.bf16.msra.mxu1 %v2170_v36  ;;  %v272_v51 = vrot.slane %v260_v44, 4  ;;  %v2205_v52 = vcombine.high %v1282_v6, %v1282_v6  ;;  %v2207_v53 = vcombine.high %v1283_v50, %v1283_v50 }
  0xd0   : > { %v2204_v57 = vcombine.low %v1282_v6, %v1282_v6  ;;  %v2206_v59 = vcombine.low %v1283_v50, %v1283_v50 }
  0xd1   : > { %v286_v12 = vsel %vm276_vm0, %v271_v2, %v272_v51  ;;  %v288_v60 = vsel %vm276_vm0, %v272_v51, %v273_v47  ;;  %2220 = vmatprep.subr.msk.bf16.mxu0 %vm1496_vm3, %v2205_v52  ;;  %2222 = vmatprep.subr.msk.bf16.mxu1 %vm1496_vm3, %v2207_v53 }
  0xd2   : > { %v287_v61 = vsel %vm278_vm2, %v2655_v27, %v286_v12  ;;  %v289_v25 = vsel %vm278_vm2, %v260_v44, %v288_v60  ;;  %v2756_v63 = vpop.permute.xlu1 %483  ;;  %2217 = vmatmul.mubr.msk.bf16.vlgmr.msra.gmra.mxu0 %vm1492_vm4, %v2661_v0  ;;  %2219 = vmatmul.mubr.msk.bf16.vlgmr.msra.gmra.mxu1 %vm1492_vm4, %v2661_v0  ;;  %v1522_v2 = vsel %vm1496_vm3, %v2204_v57, 0  ;;  %v1528_v3 = vsel %vm1496_vm3, %v2206_v59, 0  ;;  %v482_v7 = vpop.permute.xlu0 %481  ;;  %v1266_v48 = vld [vmem:[#allocation2 + $0xa0] sm:$0xff]  ;;  %v1267_v46 = vld [vmem:[#allocation2 + $0xa8] sm:$0xff] }
  0xd3   : > { %306 = vst [vmem:[#allocation2 + $0x20] sm:$0x33] %v287_v61  ;;  %307 = vst [vmem:[#allocation2 + $0x28] sm:$0x33] %v289_v25  ;;  %v495_v49 = vrot.slane %v2756_v63, 4  ;;  %1720 = vmatpush1.bf16.msra.mxu0 %v1522_v2  ;;  %1761 = vmatpush1.bf16.msra.mxu1 %v1528_v3  ;;  %v494_v27 = vrot.slane %v482_v7, 4 }
  0xd4   : > { %1741 = vmatprep.mubr.bf16.mxu0 %v2298_v56  ;;  %1782 = vmatprep.mubr.bf16.mxu1 %v2298_v56 }
  0xd5   : > { %v507_v8 = vsel %vm276_vm0, %v493_v45, %v494_v27  ;;  %v509_v33 = vsel %vm276_vm0, %v494_v27, %v495_v49 }
  0xd6   : > { %v508_v10 = vsel %vm499_vm1, %v2674_v41, %v507_v8  ;;  %v510_v37 = vsel %vm499_vm1, %v482_v7, %v509_v33  ;;  %v2776_v11 = vpop.permute.xlu1 %621  ;;  %v620_v14 = vpop.permute.xlu0 %619  ;;  %v1274_v16 = vld [vmem:[#allocation2 + $0xe0] sm:$0xff]  ;;  %v1275_v43 = vld [vmem:[#allocation2 + $0xe8] sm:$0xff] }
  0xd7   : > { %527 = vst [vmem:[#allocation2 + $0x60] sm:$0x33] %v508_v10  ;;  %528 = vst [vmem:[#allocation2 + $0x68] sm:$0x33] %v510_v37  ;;  %v633_v17 = vrot.slane %v2776_v11, 4  ;;  %v632_v45 = vrot.slane %v620_v14, 4  ;;  %v2188_v18 = vcombine.low %v1266_v48, %v1274_v16  ;;  %v2189_v20 = vcombine.high %v1266_v48, %v1274_v16 }
  0xd8   : > { %v2190_v58 = vcombine.low %v1267_v46, %v1275_v43  ;;  %v2191_v23 = vcombine.high %v1267_v46, %v1275_v43 }
  0xd9   : > { %v644_v41 = vsel %vm276_vm0, %v631_v62, %v632_v45  ;;  %v646_v55 = vsel %vm276_vm0, %v632_v45, %v633_v17  ;;  %1721 = vmatprep.subr.bf16.mxu0 %v2189_v20 }
  0xda   : > { %v645_v24 = vsel %vm278_vm2, %v2694_v54, %v644_v41  ;;  %v647_v28 = vsel %vm278_vm2, %v620_v14, %v646_v55  ;;  %1762 = vmatprep.subr.bf16.mxu1 %v2191_v23  ;;  %v1203_v29 = vpop.permute.xlu1 %1202  ;;  %1722 = vmatpush1.bf16.msra.mxu0 %v2188_v18  ;;  %v1201_v30 = vpop.permute.xlu0 %1200  ;;  %v1250_v6 = vld [vmem:[#allocation2 + $0x20] sm:$0xff]  ;;  %v1251_v12 = vld [vmem:[#allocation2 + $0x28] sm:$0xff] }
  0xdb   : > { %664 = vst [vmem:[#allocation2 + $0x60] sm:$0xcc] %v645_v24  ;;  %665 = vst [vmem:[#allocation2 + $0x68] sm:$0xcc] %v647_v28  ;;  %v1212_v22 = vrot.slane %v1203_v29, 4  ;;  %1763 = vmatpush1.bf16.msra.mxu1 %v2190_v58  ;;  %v1211_v4 = vrot.slane %v1201_v30, 4 }
  0xdd   : > { %v1225_v62 = vsel %vm276_vm0, %v1210_v15, %v1211_v4  ;;  %v1227_v32 = vsel %vm276_vm0, %v1211_v4, %v1212_v22 }
  0xde   : > { %v1226_v54 = vsel %vm499_vm1, %v2706_v13, %v1225_v62  ;;  %v1228_v34 = vsel %vm499_vm1, %v1201_v30, %v1227_v32  ;;  %v847_v35 = vpop.permute.xlu1 %846  ;;  %v845_v36 = vpop.permute.xlu0 %844 }
  0xdf   : > { %1243 = vst [vmem:[#allocation2 + $0x130] sm:$0x33] %v1226_v54  ;;  %1244 = vst [vmem:[#allocation2 + $0x138] sm:$0x33] %v1228_v34  ;;  %v856_v38 = vrot.slane %v847_v35, 4  ;;  %v855_v1 = vrot.slane %v845_v36, 4 }
  0xe1   : > { %v869_v39 = vsel %vm276_vm0, %v854_v21, %v855_v1  ;;  %v871_v40 = vsel %vm276_vm0, %v855_v1, %v856_v38 }
  0xe2   : > { %v870_v15 = vsel %vm499_vm1, %v2718_v19, %v869_v39  ;;  %v872_v9 = vsel %vm499_vm1, %v845_v36, %v871_v40  ;;  %v983_v13 = vpop.permute.xlu1 %982  ;;  %v981_v44 = vpop.permute.xlu0 %980  ;;  %v1258_v50 = vld [vmem:[#allocation2 + $0x60] sm:$0xff]  ;;  %v1259_v51 = vld [vmem:[#allocation2 + $0x68] sm:$0xff] }
  0xe3   : > { %887 = vst [vmem:[#allocation2 + $0xb0] sm:$0xcc] %v870_v15  ;;  %888 = vst [vmem:[#allocation2 + $0xb8] sm:$0xcc] %v872_v9  ;;  %v992_v52 = vrot.slane %v983_v13, 4  ;;  %v991_v53 = vrot.slane %v981_v44, 4  ;;  %v2172_v57 = vcombine.low %v1250_v6, %v1258_v50  ;;  %v2173_v59 = vcombine.high %v1250_v6, %v1258_v50 }
  0xe4   : > { %v2174_v21 = vcombine.low %v1251_v12, %v1259_v51  ;;  %v2175_v60 = vcombine.high %v1251_v12, %v1259_v51 }
  0xe5   : > { %v1005_v19 = vsel %vm276_vm0, %v990_v31, %v991_v53  ;;  %v1007_v61 = vsel %vm276_vm0, %v991_v53, %v992_v52  ;;  %1723 = vmatprep.subr.bf16.mxu0 %v2173_v59 }
  0xe6   : > { %v1006_v25 = vsel %vm278_vm2, %v2730_v26, %v1005_v19  ;;  %v1008_v2 = vsel %vm278_vm2, %v981_v44, %v1007_v61  ;;  %1764 = vmatprep.subr.bf16.mxu1 %v2175_v60  ;;  %v266_v3 = vpop.permute.xlu1 %265  ;;  %1724 = vmatpush1.bf16.msra.mxu0 %v2172_v57  ;;  %v264_v7 = vpop.permute.xlu0 %263  ;;  %v1284_v27 = vld [vmem:[#allocation2 + $0x130] sm:$0x33]  ;;  %v1285_v8 = vld [vmem:[#allocation2 + $0x138] sm:$0x33] }
  0xe7   : > { %1023 = vst [vmem:[#allocation2 + $0xf0] sm:$0x33] %v1006_v25  ;;  %1024 = vst [vmem:[#allocation2 + $0xf8] sm:$0x33] %v1008_v2  ;;  %v275_v33 = vrot.slane %v266_v3, 4  ;;  %1765 = vmatpush1.bf16.msra.mxu1 %v2174_v21  ;;  %v274_v10 = vrot.slane %v264_v7, 4  ;;  %v2209_v31 = vcombine.high %v1284_v27, %v1284_v27  ;;  %v2211_v37 = vcombine.high %v1285_v8, %v1285_v8 }
  0xe8   : > { %v2208_v14 = vcombine.low %v1284_v27, %v1284_v27  ;;  %v2210_v48 = vcombine.low %v1285_v8, %v1285_v8 }
  0xe9   : > { %v290_v26 = vsel %vm276_vm0, %v273_v47, %v274_v10  ;;  %v292_v16 = vsel %vm276_vm0, %v274_v10, %v275_v33  ;;  %2224 = vmatprep.subr.msk.bf16.mxu0 %vm1496_vm3, %v2209_v31  ;;  %2226 = vmatprep.subr.msk.bf16.mxu1 %vm1496_vm3, %v2211_v37 }
  0xea   : > { %v291_v43 = vsel %vm278_vm2, %v2742_v42, %v290_v26  ;;  %v293_v45 = vsel %vm278_vm2, %v264_v7, %v292_v16  ;;  %v488_v18 = vpop.permute.xlu1 %487  ;;  %2221 = vmatmul.mubr.msk.bf16.vlgmr.msra.gmra.mxu0 %vm1492_vm4, %v2661_v0  ;;  %2223 = vmatmul.mubr.msk.bf16.vlgmr.msra.gmra.mxu1 %vm1492_vm4, %v2661_v0  ;;  %v1534_v47 = vsel %vm1496_vm3, %v2208_v14, 0  ;;  %v1540_v20 = vsel %vm1496_vm3, %v2210_v48, 0  ;;  %v486_v46 = vpop.permute.xlu0 %485  ;;  %v1268_v30 = vld [vmem:[#allocation2 + $0xb0] sm:$0xff]  ;;  %v1269_v34 = vld [vmem:[#allocation2 + $0xb8] sm:$0xff] }
  0xeb   : > { %308 = vst [vmem:[#allocation2 + $0x30] sm:$0x33] %v291_v43  ;;  %309 = vst [vmem:[#allocation2 + $0x38] sm:$0x33] %v293_v45  ;;  %v497_v58 = vrot.slane %v488_v18, 4  ;;  %1802 = vmatpush1.bf16.msra.mxu0 %v1534_v47  ;;  %1843 = vmatpush1.bf16.msra.mxu1 %v1540_v20  ;;  %v496_v42 = vrot.slane %v486_v46, 4 }
  0xec   : > { %1823 = vmatprep.mubr.bf16.mxu0 %v2298_v56  ;;  %1864 = vmatprep.mubr.bf16.mxu1 %v2298_v56 }
  0xed   : > { %v511_v23 = vsel %vm276_vm0, %v495_v49, %v496_v42  ;;  %v513_v41 = vsel %vm276_vm0, %v496_v42, %v497_v58 }
  0xee   : > { %v512_v55 = vsel %vm499_vm1, %v2756_v63, %v511_v23  ;;  %v514_v24 = vsel %vm499_vm1, %v486_v46, %v513_v41  ;;  %v626_v28 = vpop.permute.xlu1 %625  ;;  %v624_v29 = vpop.permute.xlu0 %623  ;;  %v1276_v22 = vld [vmem:[#allocation2 + $0xf0] sm:$0xff]  ;;  %v1277_v4 = vld [vmem:[#allocation2 + $0xf8] sm:$0xff] }
  0xef   : > { %529 = vst [vmem:[#allocation2 + $0x70] sm:$0x33] %v512_v55  ;;  %530 = vst [vmem:[#allocation2 + $0x78] sm:$0x33] %v514_v24  ;;  %v635_v62 = vrot.slane %v626_v28, 4  ;;  %v634_v56 = vrot.slane %v624_v29, 4  ;;  %v2192_v32 = vcombine.low %v1268_v30, %v1276_v22  ;;  %v2193_v54 = vcombine.high %v1268_v30, %v1276_v22 }
  0xf0   : > { %v2194_v49 = vcombine.low %v1269_v34, %v1277_v4  ;;  %v2195_v35 = vcombine.high %v1269_v34, %v1277_v4 }
  0xf1   : > { %v648_v63 = vsel %vm276_vm0, %v633_v17, %v634_v56  ;;  %v650_v36 = vsel %vm276_vm0, %v634_v56, %v635_v62  ;;  %1803 = vmatprep.subr.bf16.mxu0 %v2193_v54 }
  0xf2   : > { %v649_v38 = vsel %vm278_vm2, %v2776_v11, %v648_v63  ;;  %v651_v1 = vsel %vm278_vm2, %v624_v29, %v650_v36  ;;  %1844 = vmatprep.subr.bf16.mxu1 %v2195_v35  ;;  %1804 = vmatpush1.bf16.msra.mxu0 %v2192_v32  ;;  %v1252_v39 = vld [vmem:[#allocation2 + $0x30] sm:$0xff]  ;;  %v1253_v15 = vld [vmem:[#allocation2 + $0x38] sm:$0xff] }
  0xf3   : > { %666 = vst [vmem:[#allocation2 + $0x70] sm:$0xcc] %v649_v38  ;;  %667 = vst [vmem:[#allocation2 + $0x78] sm:$0xcc] %v651_v1  ;;  %1845 = vmatpush1.bf16.msra.mxu1 %v2194_v49 }
  0xfa   : > { %v1260_v40 = vld [vmem:[#allocation2 + $0x70] sm:$0xff]  ;;  %v1261_v9 = vld [vmem:[#allocation2 + $0x78] sm:$0xff] }
  0xfb   : > { %v2176_v13 = vcombine.low %v1252_v39, %v1260_v40  ;;  %v2177_v44 = vcombine.high %v1252_v39, %v1260_v40  ;;  %v2178_v17 = vcombine.low %v1253_v15, %v1261_v9  ;;  %v2179_v6 = vcombine.high %v1253_v15, %v1261_v9  ;;  %v2844_v11 = vpop.permute.xlu0 %1289 }
  0xfd   : > { %1805 = vmatprep.subr.bf16.mxu0 %v2177_v44  ;;  %1846 = vmatprep.subr.bf16.mxu1 %v2179_v6 }
  0xfe   : > { %1806 = vmatpush1.bf16.msra.mxu0 %v2176_v13  ;;  %1847 = vmatpush1.bf16.msra.mxu1 %v2178_v17 }
 0x101   : > { %2225 = vmatmul.mubr.msk.bf16.vlgmr.msra.gmra.mxu0 %vm1492_vm4, %v2661_v0  ;;  %2227 = vmatmul.mubr.msk.bf16.vlgmr.msra.gmra.mxu1 %vm1492_vm4, %v2661_v0 }
 0x17a   : > { %v1579_v50 = vpop.f32.mrf.mxu0  ;;  %v1620_v51 = vpop.f32.mrf.mxu1 }
 0x17b   : > { %v1580_v52 = vadd.f32 %v1579_v50, %v2844_v11  ;;  %v1621_v53 = vadd.f32 %v1620_v51, %v2844_v11 }
 0x17c   : > { %v1581_v57 = vpop.f32.mrf.mxu0  ;;  %v1622_v59 = vpop.f32.mrf.mxu1 }
 0x17d   : > { %v1582_v12 = vadd.f32 %v1581_v57, %v2844_v11  ;;  %v1623_v21 = vadd.f32 %v1622_v59, %v2844_v11  ;;  %v1873_v60 = vpack.c.bf16 %v1580_v52, %v1580_v52  ;;  %v1875_v19 = vpack.c.bf16 %v1621_v53, %v1621_v53 }
 0x17e   : > { %v1583_v61 = vpop.f32.mrf.mxu0  ;;  %v1624_v25 = vpop.f32.mrf.mxu1 }
 0x17f   : > { %v1874_v0 = vpack.c.bf16 %v1582_v12, %v1582_v12  ;;  %v1876_v2 = vpack.c.bf16 %v1623_v21, %v1623_v21  ;;  %v1890_v3 = vrot.slane %v1873_v60, 2  ;;  %v1894_v7 = vrot.slane %v1875_v19, 2 }
 0x180   : > { %v1584_v27 = vpop.f32.mrf.mxu0  ;;  %v1625_v8 = vpop.f32.mrf.mxu1 }
 0x181   : > { %v1892_v33 = vrot.slane %v1874_v0, 2  ;;  %v1896_v10 = vrot.slane %v1876_v2, 2  ;;  %v1921_v31 = vcombine.low %v1873_v60, %v1890_v3  ;;  %v1938_v37 = vcombine.low %v1875_v19, %v1894_v7 }
 0x183   : > { %v1922_v14 = vcombine.low %v1874_v0, %v1892_v33  ;;  %v1929_v48 = vrot.slane %v1921_v31, %v2330_v5  ;;  %v1939_v26 = vcombine.low %v1876_v2, %v1896_v10  ;;  %v1946_v16 = vrot.slane %v1938_v37, %v2330_v5 }
 0x185   : > { %v1936_v43 = vrot.slane %v1922_v14, %v2330_v5  ;;  %v1953_v45 = vrot.slane %v1939_v26, %v2330_v5 }
 0x187   : > { %v1937_v18 = vcombine.low %v1929_v48, %v1936_v43  ;;  %v1954_v47 = vcombine.low %v1946_v16, %v1953_v45 }
 0x189   : > { %2065 = vst [vmem:[%s2858_s27] sm:$0xff] %v1937_v18  ;;  %2066 = vst [vmem:[%s2858_s27 + $0x8] sm:$0xff] %v1954_v47 }
 0x192   : > { %v1661_v20 = vpop.f32.mrf.mxu0  ;;  %v1702_v46 = vpop.f32.mrf.mxu1 }
 0x193   : > { %v1662_v58 = vadd.f32 %v1661_v20, %v2844_v11  ;;  %v1703_v42 = vadd.f32 %v1702_v46, %v2844_v11 }
 0x194   : > { %v1663_v23 = vpop.f32.mrf.mxu0  ;;  %v1704_v41 = vpop.f32.mrf.mxu1 }
 0x195   : > { %v1877_v55 = vpack.c.bf16 %v1662_v58, %v1662_v58  ;;  %v1879_v24 = vpack.c.bf16 %v1703_v42, %v1703_v42  ;;  %v1664_v28 = vadd.f32 %v1663_v23, %v2844_v11  ;;  %v1705_v29 = vadd.f32 %v1704_v41, %v2844_v11 }
 0x196   : > { %v1665_v30 = vpop.f32.mrf.mxu0  ;;  %v1706_v22 = vpop.f32.mrf.mxu1 }
 0x197   : > { %v1898_v4 = vrot.slane %v1877_v55, 2  ;;  %v1902_v62 = vrot.slane %v1879_v24, 2  ;;  %v1878_v56 = vpack.c.bf16 %v1664_v28, %v1664_v28  ;;  %v1880_v32 = vpack.c.bf16 %v1705_v29, %v1705_v29 }
 0x198   : > { %v1666_v54 = vpop.f32.mrf.mxu0  ;;  %v1707_v34 = vpop.f32.mrf.mxu1 }
 0x199   : > { %v1955_v49 = vcombine.low %v1877_v55, %v1898_v4  ;;  %v1972_v35 = vcombine.low %v1879_v24, %v1902_v62  ;;  %v1900_v63 = vrot.slane %v1878_v56, 2  ;;  %v1904_v36 = vrot.slane %v1880_v32, 2 }
 0x19b   : > { %v1963_v38 = vrot.slane %v1955_v49, %v2330_v5  ;;  %v1980_v1 = vrot.slane %v1972_v35, %v2330_v5  ;;  %v1956_v39 = vcombine.low %v1878_v56, %v1900_v63  ;;  %v1973_v40 = vcombine.low %v1880_v32, %v1904_v36 }
 0x19d   : > { %v1970_v15 = vrot.slane %v1956_v39, %v2330_v5  ;;  %v1987_v9 = vrot.slane %v1973_v40, %v2330_v5 }
 0x19f   : > { %v1971_v13 = vcombine.low %v1963_v38, %v1970_v15  ;;  %v1988_v44 = vcombine.low %v1980_v1, %v1987_v9 }
 0x1a1   : > { %2067 = vst [vmem:[%s2858_s27 + $0x10] sm:$0xff] %v1971_v13  ;;  %2068 = vst [vmem:[%s2858_s27 + $0x18] sm:$0xff] %v1988_v44 }
 0x1aa   : > { %v1743_v17 = vpop.f32.mrf.mxu0  ;;  %v1784_v6 = vpop.f32.mrf.mxu1 }
 0x1ab   : > { %v1744_v50 = vadd.f32 %v1743_v17, %v2844_v11  ;;  %v1785_v51 = vadd.f32 %v1784_v6, %v2844_v11 }
 0x1ac   : > { %v1745_v52 = vpop.f32.mrf.mxu0  ;;  %v1786_v53 = vpop.f32.mrf.mxu1 }
 0x1ad   : > { %v1881_v57 = vpack.c.bf16 %v1744_v50, %v1744_v50  ;;  %v1883_v59 = vpack.c.bf16 %v1785_v51, %v1785_v51  ;;  %v1746_v12 = vadd.f32 %v1745_v52, %v2844_v11  ;;  %v1787_v21 = vadd.f32 %v1786_v53, %v2844_v11 }
 0x1ae   : > { %v1747_v60 = vpop.f32.mrf.mxu0  ;;  %v1788_v19 = vpop.f32.mrf.mxu1 }
 0x1af   : > { %v1906_v61 = vrot.slane %v1881_v57, 2  ;;  %v1910_v25 = vrot.slane %v1883_v59, 2  ;;  %v1882_v0 = vpack.c.bf16 %v1746_v12, %v1746_v12  ;;  %v1884_v2 = vpack.c.bf16 %v1787_v21, %v1787_v21 }
 0x1b0   : > { %v1748_v3 = vpop.f32.mrf.mxu0  ;;  %v1789_v7 = vpop.f32.mrf.mxu1 }
 0x1b1   : > { %v1989_v27 = vcombine.low %v1881_v57, %v1906_v61  ;;  %v2006_v8 = vcombine.low %v1883_v59, %v1910_v25  ;;  %v1908_v33 = vrot.slane %v1882_v0, 2  ;;  %v1912_v10 = vrot.slane %v1884_v2, 2 }
 0x1b3   : > { %v1997_v31 = vrot.slane %v1989_v27, %v2330_v5  ;;  %v2014_v37 = vrot.slane %v2006_v8, %v2330_v5  ;;  %v1990_v14 = vcombine.low %v1882_v0, %v1908_v33  ;;  %v2007_v48 = vcombine.low %v1884_v2, %v1912_v10 }
 0x1b5   : > { %v2004_v26 = vrot.slane %v1990_v14, %v2330_v5  ;;  %v2021_v16 = vrot.slane %v2007_v48, %v2330_v5 }
 0x1b7   : > { %v2005_v43 = vcombine.low %v1997_v31, %v2004_v26  ;;  %v2022_v45 = vcombine.low %v2014_v37, %v2021_v16 }
 0x1b9   : > { %2069 = vst [vmem:[%s2858_s27 + $0x20] sm:$0xff] %v2005_v43  ;;  %2070 = vst [vmem:[%s2858_s27 + $0x28] sm:$0xff] %v2022_v45 }
 0x1c1   : > { %v1825_v18 = vpop.f32.mrf.mxu0  ;;  %v1866_v47 = vpop.f32.mrf.mxu1 }
 0x1c2   : > { %v1826_v20 = vadd.f32 %v1825_v18, %v2844_v11  ;;  %v1867_v46 = vadd.f32 %v1866_v47, %v2844_v11 }
 0x1c3   : > { %v1827_v58 = vpop.f32.mrf.mxu0  ;;  %v1868_v42 = vpop.f32.mrf.mxu1 }
 0x1c4   : > { %v1885_v23 = vpack.c.bf16 %v1826_v20, %v1826_v20  ;;  %v1887_v41 = vpack.c.bf16 %v1867_v46, %v1867_v46  ;;  %v1828_v55 = vadd.f32 %v1827_v58, %v2844_v11  ;;  %v1869_v24 = vadd.f32 %v1868_v42, %v2844_v11 }
 0x1c5   : > { %v1829_v28 = vpop.f32.mrf.mxu0  ;;  %v1870_v29 = vpop.f32.mrf.mxu1 }
 0x1c6   : > { %v1914_v30 = vrot.slane %v1885_v23, 2  ;;  %v1918_v22 = vrot.slane %v1887_v41, 2  ;;  %v1886_v4 = vpack.c.bf16 %v1828_v55, %v1828_v55  ;;  %v1888_v62 = vpack.c.bf16 %v1869_v24, %v1869_v24 }
 0x1c7   : > { %v1830_v56 = vpop.f32.mrf.mxu0  ;;  %v1871_v32 = vpop.f32.mrf.mxu1 }
 0x1c8   : > { %v2023_v54 = vcombine.low %v1885_v23, %v1914_v30  ;;  %v2040_v34 = vcombine.low %v1887_v41, %v1918_v22  ;;  %v1916_v49 = vrot.slane %v1886_v4, 2  ;;  %v1920_v35 = vrot.slane %v1888_v62, 2 }
 0x1ca   : > { %v2024_v63 = vcombine.low %v1886_v4, %v1916_v49  ;;  %v2041_v36 = vcombine.low %v1888_v62, %v1920_v35  ;;  %v2031_v38 = vrot.slane %v2023_v54, %v2330_v5  ;;  %v2048_v11 = vrot.slane %v2040_v34, %v2330_v5 }
 0x1cc   : > { %v2038_v1 = vrot.slane %v2024_v63, %v2330_v5  ;;  %v2055_v39 = vrot.slane %v2041_v36, %v2330_v5 }
 0x1ce   : > { %v2039_v40 = vcombine.low %v2031_v38, %v2038_v1  ;;  %v2056_v15 = vcombine.low %v2048_v11, %v2055_v39 }
 0x1d0   : > { %2071 = vst [vmem:[%s2858_s27 + $0x30] sm:$0xff] %v2039_v40  ;;  %2072 = vst [vmem:[%s2858_s27 + $0x38] sm:$0xff] %v2056_v15 }
 0x1d1 PF: > { %s13_s12 = sadd.s32 1, %s2293_s12  }
 0x1d2   : > { %p10_p4 = scmp.ge.s32.totalorder %s13_s12, 4  }
 0x1d4   :  { %12 = sbr.rel (!%p10_p4) target bundleno = 1 (0x1), region = 62 }

</bundles_post_ra>
